<compile_context>
chip_gen: v7x
topology: tpu7x:2x2x1
jax: 0.10.0
libtpu: 0.0.40
codegen_flags: <defaults>
</compile_context>

<pallas_src>
import functools

import jax
import jax.numpy as jnp
from jax.experimental import pallas as pl
from jax.experimental.pallas import tpu as pltpu

_LANES = 128
_TARGET_BLOCK_BYTES = 4 * 1024 * 1024  # ~4 MiB per input block (x2 for double buffer)


def _globalmax_kernel(axis, x_ref, o_ref):
    # Reduce over the channel axis of the current tile; this is an
    # elementwise VPU max across C slices (channel axis is non-minor).
    o_ref[...] = jnp.max(x_ref[...], axis=axis)


def globalmax(x, dim=1):
    """Pallas TPU equivalent of `torch.max(x, dim=1).values` for NCHW input."""
    assert x.ndim == 4, "kernel is written for 4D NCHW inputs"
    assert dim in (1, -3), "kernel implements the default dim=1 (channel) reduction"
    N, C, H, W = x.shape
    HW = H * W
    itemsize = jnp.dtype(x.dtype).itemsize

    cost = pl.CostEstimate(
        flops=N * max(C - 1, 0) * HW,          # one compare/select per reduced elem
        transcendentals=0,
        bytes_accessed=N * C * HW * itemsize + N * HW * itemsize,
    )

    if HW % _LANES == 0:
        # Lane-dense, pipelined path: view spatial dims as (S, 128).
        S = HW // _LANES
        x3 = x.reshape(N, C, S, _LANES)        # free: row-major metadata reshape

        # Largest spatial tile (in rows of 128 lanes) keeping one input block
        # around ~4 MiB -> double-buffered footprint is safe on all generations.
        max_tile_s = max(1, _TARGET_BLOCK_BYTES // (C * _LANES * itemsize))
        if S <= max_tile_s:
            tile_s = S
        else:
            tile_s = max(8, (max_tile_s // 8) * 8)
        # TODO(synk): for extremely large C (block too big even at tile_s=8),
        # add a trailing "arbitrary" C grid axis with a resident VMEM accumulator.

        grid = (N, pl.cdiv(S, tile_s))
        out3 = pl.pallas_call(
            functools.partial(_globalmax_kernel, 0),
            out_shape=jax.ShapeDtypeStruct((N, S, _LANES), x.dtype),
            grid_spec=pltpu.PrefetchScalarGridSpec(
                num_scalar_prefetch=0,
                grid=grid,
                in_specs=[
                    # kernel view: (C, tile_s, 128); batch dim squeezed out
                    pl.BlockSpec((None, C, tile_s, _LANES),
                                 lambda n, s: (n, 0, s, 0)),
                ],
                # kernel view: (tile_s, 128)
                out_specs=pl.BlockSpec((None, tile_s, _LANES),
                                       lambda n, s: (n, s, 0)),
            ),
            compiler_params=pltpu.CompilerParams(
                dimension_semantics=("parallel", "parallel"),
            ),
            cost_estimate=cost,
        )(x3)
        return out3.reshape(N, H, W)

    # Fallback (H*W not a multiple of 128): flatten spatial dims so the minor
    # dim is H*W (denser than W alone) and process one full slab per batch elem.
    x2 = x.reshape(N, C, HW)
    out2 = pl.pallas_call(
        functools.partial(_globalmax_kernel, 1),
        out_shape=jax.ShapeDtypeStruct((N, HW), x.dtype),
        grid_spec=pltpu.PrefetchScalarGridSpec(
            num_scalar_prefetch=0,
            grid=(N,),
            in_specs=[pl.BlockSpec((1, C, HW), lambda n: (n, 0, 0))],
            out_specs=pl.BlockSpec((1, HW), lambda n: (n, 0)),
        ),
        compiler_params=pltpu.CompilerParams(
            dimension_semantics=("parallel",),
        ),
        cost_estimate=cost,
    )(x2)
    return out2.reshape(N, H, W)


if __name__ == "__main__":
    key = jax.random.PRNGKey(0)
    # small NCHW input consistent with the module's forward
    x = jax.random.normal(key, (2, 4, 16, 16), dtype=jnp.float32)

    out = globalmax(x, dim=1)
    out = jax.block_until_ready(out)

    # reference check against plain JAX
    ref = jnp.max(x, axis=1)
    assert out.shape == ref.shape == (2, 16, 16)
    assert out.dtype == x.dtype
    assert jnp.allclose(out, ref), "mismatch vs reference max reduction"

    print("KERNEL_OK")
</pallas_src>

<mosaic_0001>
module attributes {stable_mosaic.version = 11 : i64} {
  func.func @_globalmax_kernel(%arg0: i32, %arg1: i32, %arg2: memref<1x4x2x128xf32, #tpu.memory_space<vmem>>, %arg3: memref<1x2x128xf32, #tpu.memory_space<vmem>>) attributes {dimension_semantics = [#tpu.dimension_semantics<parallel>, #tpu.dimension_semantics<parallel>], iteration_bounds = array<i64: 2, 1>, scalar_prefetch = 0 : i64, scratch_operands = 0 : i64, tpu.core_type = #tpu.core_type<tc>, window_params = [{transform_indices = @transform_0, window_bounds = array<i64: 1, 4, 2, 128>}, {transform_indices = @transform_1, window_bounds = array<i64: 1, 2, 128>}]} {
    %c0 = arith.constant 0 : index
    %c0_0 = arith.constant 0 : index
    %c0_1 = arith.constant 0 : index
    %c0_2 = arith.constant 0 : index
    %0 = vector.load %arg2[%c0, %c0_0, %c0_1, %c0_2] : memref<1x4x2x128xf32, #tpu.memory_space<vmem>>, vector<1x4x2x128xf32>
    %1 = vector.shape_cast %0 : vector<1x4x2x128xf32> to vector<4x2x128xf32>
    %cst = arith.constant dense<0xFF800000> : vector<2x128xf32>
    %2 = vector.multi_reduction <maximumf>, %1, %cst [0] : vector<4x2x128xf32> to vector<2x128xf32>
    %c0_3 = arith.constant 0 : index
    %c0_4 = arith.constant 0 : index
    %c0_5 = arith.constant 0 : index
    %3 = vector.load %arg3[%c0_3, %c0_4, %c0_5] : memref<1x2x128xf32, #tpu.memory_space<vmem>>, vector<1x2x128xf32>
    %4 = vector.shape_cast %3 : vector<1x2x128xf32> to vector<2x128xf32>
    %5 = vector.shape_cast %2 : vector<2x128xf32> to vector<1x2x128xf32>
    tpu.vector_store %arg3[%c0_3, %c0_4, %c0_5], %5 {strides = array<i32>} : memref<1x2x128xf32, #tpu.memory_space<vmem>>, vector<1x2x128xf32>,
    return
  }
  func.func @transform_0(%arg0: i32, %arg1: i32) -> (i32, i32, i32, i32) {
    %c0_i32 = arith.constant 0 : i32
    %c0_i32_0 = arith.constant 0 : i32
    %c0_i32_1 = arith.constant 0 : i32
    return %arg0, %c0_i32, %arg1, %c0_i32_0 : i32, i32, i32, i32
  }
  func.func @transform_1(%arg0: i32, %arg1: i32) -> (i32, i32, i32) {
    %c0_i32 = arith.constant 0 : i32
    %c0_i32_0 = arith.constant 0 : i32
    return %arg0, %arg1, %c0_i32 : i32, i32, i32
  }
}

</mosaic_0001>

<bundles_post_ra>
// kernel: tpu_custom_call.1
= control target key start
LH: loop header
LB: loop body
LE: loop exit
PB: predicated region body
PF: predicated region fallthrough
CT: control target
= control target key end

     0   :  { %6 = vsyncpa [#allocation3], 0  ;;  %s642_s0 = inlined_call_operand.hbm [shape: f32[2,4,2,128], index: 0, kind: input, shape index: {}]   ;;  %s643_s1 = inlined_call_operand.hbm [shape: f32[2,2,128], index: 1, kind: output, shape index: {}]  }
   0x1   :  { %8 = vsyncpa [#allocation3 + $0x1], 0 }
   0x2   :  { %9 = vsyncpa [#allocation4], 0 }
   0x3   :  { %11 = vsyncpa [#allocation4 + $0x1], 0  ;;  %s468_s6 = smov 0   ;;  %s470_s7 = smov 0  }
   0x4   :  { %s472_s8 = smov 0   ;;  %s474_s9 = smov 0  }
   0x5   :  { %s476_s10 = smov 0   ;;  %s478_s11 = smov 0  }
   0x6 LB: > { %s261_s12 = sadd.s32 4294967295, %s452_s11   ;;  %s262_s13 = sadd.s32 4294967294, %s452_s11   ;;  %s452_s11 = sphi %s478_s11, %s17_s11   ;;  %s448_s10 = sphi %s476_s10, %s658_s10   ;;  %s444_s9 = sphi %s474_s9, %s657_s9   ;;  %s440_s8 = sphi %s472_s8, %s656_s8   ;;  %s436_s7 = sphi %s470_s7, %s655_s7   ;;  %s432_s6 = sphi %s468_s6, %s654_s6  }
   0x7   : > { %s29_s14 = sadd.s32 1, %s448_s10  ;;  %s38_s15 = sadd.s32 1, %s440_s8 }
   0x8   : > { %p31_p0 = scmp.ge.s32.totalorder %s29_s14, 2  ;;  %p45_p1 = scmp.ne.s32.totalorder %s440_s8, %s436_s7 }
   0x9   : > { %p46_p2 = scmp.eq.s32.totalorder %s452_s11, 0  ;;  %p51_p3 = scmp.ne.s32.totalorder %s436_s7, %s432_s6 }
   0xa   : > { %s660_s14 = smov (%p31_p0, %s29_s14), 0  ;;  %p52_p5 = scmp.eq.s32.totalorder %s261_s12, 0 }
   0xb   : > { %p509_p4 = por %p46_p2, %p45_p1  ;;  %s33_s17 = ssub.s32 %s448_s10, %s660_s14 }
   0xc   : > { %p77_p6 = scmp.eq.s32.totalorder %s261_s12, 1  ;;  %p36_p7 = scmp.eq.s32.totalorder %s33_s17, 0 }
   0xd   : > { %p515_p8 = por %p52_p5, %p51_p3  ;;  %p83_p10 = scmp.eq.s32.totalorder %s262_s13, 1 }
   0xe   : > { %p519_p9 = por %p77_p6, %p45_p1  ;;  %p288_p13 = scmp.lt.s32.totalorder %s452_s11, 2 }
   0xf   : > { %s524_s20 = scalar_select %p36_p7, %s440_s8, %s38_s15  }
  0x10   : > { %s647_s19 = scalar_select %p519_p9, 1, 0 }
  0x11   : > { %p526_p11 = por %p83_p10, %p51_p3  ;;  %s103_s22 = sand.u32 1, %s440_s8  }
  0x12   : > { %s265_s23 = sshll.u32 %s103_s22, 3  ;;  %s275_s24 = sshll.u32 %s448_s10, 7 }
  0x13   : > { %s648_s21 = scalar_select %p526_p11, 1, 0 }
  0x14   : > { %s537_s27 = scalar_lea.hbm %s642_s0, %s275_s24  ;;  %s107_s28 = scalar_lea.vmem [#allocation2], %s265_s23 }
  0x15   : > { %s115_s29 = sshll.u32 %s107_s28, 4  ;;  %p543_p0 = pnand %p288_p13, %p509_p4  ;;  %s539_s29 = int_to_ptr.vmem [resolvable:$true] %s115_s29 }
  0x16   : > { %s548_s2 = scalar_lea.sflag [#allocation3], %s103_s22  ;;  %s340_s3 = scalar_lea.hbm %s537_s27, 128 }
  0x17   : > { %p341_p2 = scmp.ne.s32.totalorder %s537_s27, %s340_s3  ;;  %p342_p3 = pneg %p543_p0 }
  0x18   : > { %s345_s12 = scalar_lea.hbm %s642_s0, 256  ;;  %p346_p4 = scmp.lt.u32.totalorder %s537_s27, %s642_s0 }
  0x19   : > { %p343_p5 = pnand %p342_p3, %p341_p2  ;;  %p347_p7 = scmp.lt.u32.totalorder %s345_s12, %s340_s3 }
  0x1a   : > { %p349_p13 = scmp.lt.u32.totalorder %s340_s3, %s537_s27 }
  0x1b   : > { %p344_p6 = pneg %p343_p5  ;;  %p348_p10 = por %p347_p7, %p346_p4 }
  0x1d   : > { %p350_p12 = por %p349_p13, %p348_p10 }
  0x1f   : > { %p351_p1 = pnand %p350_p12, %p344_p6 }
  0x21   : > { %354 = shalt.err (!%p351_p1)
}
  0x22   : > { %s355_s16 = scalar_lea.vmem %s539_s29, 128  ;;  %s454_s17 = smov [#allocation2]  }
  0x23   : > { %p356_p2 = scmp.ne.s32.totalorder %s539_s29, %s355_s16  ;;  %s360_s22 = sshll.u32 %s454_s17, 4  ;;  %s361_s22 = int_to_ptr.vmem [resolvable:$false] %s360_s22 }
  0x24   : > { %s362_s23 = scalar_lea.vmem %s361_s22, 256  ;;  %p363_p9 = scmp.lt.s32.totalorder %s539_s29, %s361_s22 }
  0x25   : > { %p358_p5 = pnand %p356_p2, %p342_p3  ;;  %p364_p4 = scmp.lt.s32.totalorder %s362_s23, %s355_s16 }
  0x27   : > { %p359_p11 = pneg %p358_p5  ;;  %p365_p7 = por %p364_p4, %p363_p9 }
  0x29   : > { %p366_p10 = pnand %p365_p7, %p359_p11 }
  0x2b   : > { %369 = shalt.err (!%p366_p10)
}
  0x2c   : > { %s455_s24 = smov 32   ;;  %s456_s25 = smov 2  }
  0x2d   : > { %283 = dma.hbm_to_vmem [thread:$0]  (!%p543_p0), %s537_s27, 128, %s539_s29, %s548_s2, %s455_s24, %s455_s24, %s456_s25  }
  0x2e   : > { %p123_p12 = scmp.lt.s32.totalorder %s452_s11, 3  ;;  %p650_p1 = scmp.ge.s32.totalorder %s452_s11, 1 }
  0x30   : > { %p124_p3 = pnand %p650_p1, %p123_p12 }
  0x31   : > { %s580_s26 = sand.u32 (!%p124_p3), 1, %s436_s7  }
  0x32   : > { %127 = sbr.rel (%p124_p3) target bundleno = 84 (0x54), region = 24  ;;  %s269_s28 = sshll.u32 (!%p124_p3), %s580_s26, 3 }
  0x33   : > { %s130_s3 = scalar_lea.sflag (!%p124_p3), [#allocation3], %s580_s26  ;;  %s133_s4 = scalar_lea.vmem (!%p124_p3), [#allocation2], %s269_s28 }
  0x39   : > { %423 = dma.done.wait (%p515_p8), %s130_s3, 128  }
  0x3a   : > { %425 = vsyncadd (%p515_p8), %s130_s3, 4294967168  ;;  %s270_s27 = sshll.u32 %s580_s26, 1  ;;  %vm156_vm0 = vcmask 1041408   ;;  %v152_v0 = vld [vmem:[%s133_s4] sm:$0x3]  ;;  %s272_s2 = sshll.u32 %s444_s9, 5 }
  0x3b   : > { %v153_v1 = vld [vmem:[%s133_s4 + $0x2] sm:$0x3]  ;;  %v154_v2 = vld [vmem:[%s133_s4 + $0x4] sm:$0x3]  ;;  %v155_v3 = vld [vmem:[%s133_s4 + $0x6] sm:$0x3]  ;;  %s595_s12 = scalar_lea.hbm %s643_s1, %s272_s2 }
  0x3c   : > { %v157_v4 = vsel %vm156_vm0, %v152_v0, -inf  ;;  %v158_v5 = vsel %vm156_vm0, %v153_v1, -inf  ;;  %v159_v6 = vsel %vm156_vm0, %v154_v2, -inf  ;;  %v160_v7 = vsel %vm156_vm0, %v155_v3, -inf  ;;  %s151_s29 = scalar_lea.vmem [#allocation5], %s270_s27  ;;  %s166_s13 = scalar_lea.sflag [#allocation4], %s580_s26 }
  0x3d   : > { %v161_v8 = vmax.f32 %v157_v4, %v158_v5  ;;  %s180_s30 = sshll.u32 %s151_s29, 4  ;;  %v162_v9 = vmax.f32 %v159_v6, %v160_v7  ;;  %p651_p9 = scmp.ne.s32.totalorder %s647_s19, 0  ;;  %s590_s30 = int_to_ptr.vmem [resolvable:$true] %s180_s30 }
  0x3e   : > { %s370_s15 = scalar_lea.vmem %s590_s30, 32  ;;  %s457_s9 = smov [#allocation5]  }
  0x3f   : > { %v163_v10 = vmax.f32 %v161_v8, %v162_v9  ;;  %p371_p8 = scmp.ne.s32.totalorder %s590_s30, %s370_s15  ;;  %s374_s16 = sshll.u32 %s457_s9, 4  ;;  %s375_s16 = int_to_ptr.vmem [resolvable:$false] %s374_s16 }
  0x40   : > { %s376_s17 = scalar_lea.vmem %s375_s16, 64  ;;  %p377_p6 = scmp.lt.s32.totalorder %s590_s30, %s375_s16 }
  0x41   : > { %164 = vst [vmem:[%s151_s29] sm:$0x3] %v163_v10  ;;  %p372_p11 = pnand %p371_p8, %p651_p9  ;;  %p378_p13 = scmp.lt.s32.totalorder %s376_s17, %s370_s15 }
  0x43   : > { %p373_p0 = pneg %p372_p11  ;;  %p379_p2 = por %p378_p13, %p377_p6 }
  0x45   : > { %p380_p5 = pnand %p379_p2, %p373_p0 }
  0x47   : > { %383 = shalt.err (!%p380_p5)
}
  0x48   : > { %s384_s22 = scalar_lea.hbm %s595_s12, 32  ;;  %s388_s25 = scalar_lea.hbm %s643_s1, 64 }
  0x49   : > { %p385_p4 = scmp.ne.s32.totalorder %s595_s12, %s384_s22  ;;  %p389_p12 = scmp.lt.u32.totalorder %s595_s12, %s643_s1 }
  0x4a   : > { %p390_p1 = scmp.lt.u32.totalorder %s388_s25, %s384_s22  ;;  %p392_p8 = scmp.lt.u32.totalorder %s384_s22, %s595_s12 }
  0x4b   : > { %p386_p7 = pnand %p385_p4, %p651_p9 }
  0x4c   : > { %p391_p3 = por %p390_p1, %p389_p12 }
  0x4d   : > { %p387_p10 = pneg %p386_p7 }
  0x4e   : > { %p393_p11 = por %p392_p8, %p391_p3 }
  0x50   : > { %p394_p0 = pnand %p393_p11, %p387_p10 }
  0x52   : > { %397 = shalt.err (!%p394_p0)
}
  0x53   : > { %278 = dma.vmem_to_hbm [thread:$0]  (%p651_p9), %s590_s30, 32, %s595_s12, %s166_s13  }
  0x54 PF: > { %s192_s3 = sand.u32 1, %s432_s6   ;;  %p652_p6 = scmp.ne.s32.totalorder %s648_s21, 0 }
  0x55   : > { %p653_p13 = scmp.ge.s32.totalorder %s452_s11, 2  ;;  %s193_s4 = scalar_lea.sflag [#allocation4], %s192_s3 }
  0x57   : > { %p285_p2 = pnand %p653_p13, %p652_p6 }
  0x59   : > { %427 = dma.done.wait (!%p285_p2), %s193_s4, 32  }
  0x5a   : > { %429 = vsyncadd (!%p285_p2), %s193_s4, 4294967264  ;;  %s17_s11 = sadd.s32 1, %s452_s11   ;;  %s654_s6 = smov %s436_s7 }
  0x5b   : > { %p14_p5 = scmp.ge.s32.totalorder %s17_s11, 4   ;;  %s655_s7 = smov %s440_s8 }
  0x5c   : > { %s656_s8 = smov %s524_s20  ;;  %s657_s9 = smov %s448_s10 }
  0x5d   : > { %s658_s10 = smov %s660_s14  ;;  %16 = sbr.rel (!%p14_p5) target bundleno = 6 (0x6), region = 69 }
  0x64   :  { %198 = vsyncpa [#allocation3], 1 }
  0x65   :  { %200 = vsyncpa [#allocation3 + $0x1], 1 }
  0x66   :  { %201 = vsyncpa [#allocation4], 1 }
  0x67   :  { %203 = vsyncpa [#allocation4 + $0x1], 1 }

</bundles_post_ra>
